<compile_context>
chip_gen: v6e
topology: v6e:2x2x1
jax: 0.10.0
libtpu: 0.0.40
codegen_flags: <defaults>
</compile_context>

<pallas_src>
import functools

import jax
import jax.numpy as jnp
from jax.experimental import pallas as pl
from jax.experimental.pallas import tpu as pltpu


def _spatial_attention_kernel(x_ref, w_ref, col_ref, o_ref, *, img_w, ksize):
    # x_ref:   (TB, C, HW)  VMEM block (lane-dense, HW on lanes)
    # w_ref:   (2*K*K,)     SMEM conv weights, layout [c, ky, kx] row-major
    # col_ref: (1, HW)      VMEM int32 column index (p % W), precomputed
    # o_ref:   (TB, 1, HW)  VMEM output block
    tb, c, hw = x_ref.shape
    pad = ksize // 2
    f32 = jnp.float32

    # ---- fused single-pass channel sum + max over sublane-dense chunks ----
    cc = min(c, 8)
    n_full = c // cc
    acc_s = x_ref[:, 0:cc, :].astype(f32)            # (TB, cc, HW)
    acc_m = acc_s
    for j in range(1, n_full):
        chunk = x_ref[:, j * cc:(j + 1) * cc, :].astype(f32)
        acc_s = acc_s + chunk
        acc_m = jnp.maximum(acc_m, chunk)
    sum_map = jnp.sum(acc_s, axis=1)                 # (TB, HW)
    max_map = jnp.max(acc_m, axis=1)                 # (TB, HW)
    for ci in range(n_full * cc, c):                 # remainder rows (c % 8 != 0)
        row = x_ref[:, ci, :].astype(f32)
        sum_map = sum_map + row
        max_map = jnp.maximum(max_map, row)

    # ---- hoist conv weights (SMEM scalar reads); fold mean's 1/C into them ----
    inv_c = 1.0 / c
    kk = ksize * ksize
    w_mean = [w_ref[j] * inv_c for j in range(kk)]   # applied to the channel *sum*
    w_max = [w_ref[kk + j] for j in range(kk)]

    col = col_ref[...]                               # (1, HW) int32

    def flat_shift(m, s):
        # t[:, p] = m[:, p + s] if 0 <= p + s < hw else 0
        if s > 0:
            return jnp.concatenate([m[:, s:], jnp.zeros((tb, s), f32)], axis=1)
        if s < 0:
            return jnp.concatenate([jnp.zeros((tb, -s), f32), m[:, :s]], axis=1)
        return m

    # ---- unrolled KxK cross-correlation with zero padding (PyTorch conv) ----
    acc = jnp.zeros((tb, hw), f32)
    for kx in range(ksize):
        dx = kx - pad
        tap = jnp.zeros((tb, hw), f32)
        for ky in range(ksize):
            dy = ky - pad
            s = dy * img_w + dx
            j = ky * ksize + kx
            tap = tap + w_mean[j] * flat_shift(sum_map, s) \
                      + w_max[j] * flat_shift(max_map, s)
        if dx != 0:
            # zero taps whose horizontal source column falls outside the image
            valid = jnp.logical_and(col + dx >= 0, col + dx <= img_w - 1)
            tap = jnp.where(valid, tap, 0.0)
        acc = acc + tap

    o_ref[:, 0, :] = jnp.maximum(acc, 0.0).astype(o_ref.dtype)   # ReLU


def _pick_tb(b, c, hw, itemsize):
    """Batch-pack factor: largest TB dividing B whose input block fits the budget."""
    block_budget = 8 * 1024 * 1024            # per input block; Pallas double-buffers
    per_batch = max(1, c * hw * itemsize)
    tb = max(1, min(b, block_budget // per_batch))
    # once blocks are big, keep >= 2 grid steps so both v7x TensorCores get work
    if tb == b and b > 1 and per_batch * b > (2 << 20):
        tb = max(1, b // 2)
    while b % tb:
        tb -= 1
    return tb


@jax.jit
def spacial_attention_2d(x, conv_weight):
    """x: (B, C, H, W). conv_weight: (1, 2, K, K) OIHW, no bias, K in {3, 7}."""
    b, c, h, w = x.shape
    ksize = conv_weight.shape[-1]
    hw = h * w
    itemsize = jnp.dtype(x.dtype).itemsize

    x_flat = x.reshape(b, c, hw)                              # free: contiguous in NCHW
    w_flat = conv_weight.reshape(-1).astype(jnp.float32)      # (2*K*K,) -> SMEM
    col = (jnp.arange(hw, dtype=jnp.int32) % w)[None, :]      # (1, HW) column index

    tb = _pick_tb(b, c, hw, itemsize)
    grid = (b // tb,)

    kernel = functools.partial(_spatial_attention_kernel, img_w=w, ksize=ksize)
    cost = pl.CostEstimate(
        flops=int(b * hw * (2 * c + 4 * ksize * ksize)),
        transcendentals=0,
        bytes_accessed=int((b * c * hw + b * hw) * itemsize + 2 * ksize * ksize * 4 + hw * 4),
    )

    out = pl.pallas_call(
        kernel,
        out_shape=jax.ShapeDtypeStruct((b, 1, hw), x.dtype),
        grid=grid,
        in_specs=[
            pl.BlockSpec((tb, c, hw), lambda i: (i, 0, 0)),
            pl.BlockSpec(memory_space=pltpu.MemorySpace.SMEM),
            pl.BlockSpec((1, hw), lambda i: (0, 0)),
        ],
        out_specs=pl.BlockSpec((tb, 1, hw), lambda i: (i, 0, 0)),
        compiler_params=pltpu.CompilerParams(
            dimension_semantics=("parallel",),
            vmem_limit_bytes=32 * 1024 * 1024,
        ),
        cost_estimate=cost,
    )(x_flat, w_flat, col)
    return out.reshape(b, 1, h, w)


def _reference(x, conv_weight):
    mean = jnp.mean(x, axis=1, keepdims=True)
    mx = jnp.max(x, axis=1, keepdims=True)
    cat = jnp.concatenate([mean, mx], axis=1)
    pad = conv_weight.shape[-1] // 2
    out = jax.lax.conv_general_dilated(
        cat, conv_weight, window_strides=(1, 1),
        padding=((pad, pad), (pad, pad)),
        dimension_numbers=("NCHW", "OIHW", "NCHW"))
    return jax.nn.relu(out)


if __name__ == "__main__":
    key = jax.random.PRNGKey(0)
    kx_, kw_ = jax.random.split(key)

    B, C, H, W = 2, 4, 16, 16
    x = jax.random.normal(kx_, (B, C, H, W), dtype=jnp.float32)
    # Deterministic synthetic Conv2d(2, 1, kernel_size=3, bias=False) weight (OIHW).
    conv_weight = 0.2 * jax.random.normal(kw_, (1, 2, 3, 3), dtype=jnp.float32)

    out = spacial_attention_2d(x, conv_weight)
    out = jax.block_until_ready(out)

    ref = _reference(x, conv_weight)
    assert out.shape == (B, 1, H, W), out.shape
    assert jnp.allclose(out, ref, atol=1e-5, rtol=1e-5), (
        float(jnp.max(jnp.abs(out - ref))))

    print("KERNEL_OK")
</pallas_src>

<mosaic_0001>
module attributes {stable_mosaic.version = 11 : i64} {
  func.func @_spatial_attention_kernel(%arg0: i32, %arg1: memref<2x4x256xf32, #tpu.memory_space<vmem>>, %arg2: memref<18xf32, #tpu.memory_space<smem>>, %arg3: memref<1x256xi32, #tpu.memory_space<vmem>>, %arg4: memref<2x1x256xf32, #tpu.memory_space<vmem>>) attributes {dimension_semantics = [#tpu.dimension_semantics<parallel>], iteration_bounds = array<i64: 1>, scalar_prefetch = 0 : i64, scratch_operands = 0 : i64, tpu.core_type = #tpu.core_type<tc>, window_params = [{transform_indices = @transform_0, window_bounds = array<i64: 2, 4, 256>}, {transform_indices = @transform_1, window_bounds = array<i64: 18>}, {pipeline_mode = #tpu.pipeline_mode<synchronous>, transform_indices = @transform_2, window_bounds = array<i64: 1, 256>}, {transform_indices = @transform_3, window_bounds = array<i64: 2, 1, 256>}]} {
    %c0 = arith.constant 0 : index
    %c0_0 = arith.constant 0 : index
    %c0_1 = arith.constant 0 : index
    %0 = vector.load %arg1[%c0, %c0_0, %c0_1] : memref<2x4x256xf32, #tpu.memory_space<vmem>>, vector<2x4x256xf32>
    %cst = arith.constant dense<0.000000e+00> : vector<2x256xf32>
    %1 = vector.multi_reduction <add>, %0, %cst [1] : vector<2x4x256xf32> to vector<2x256xf32>
    %cst_2 = arith.constant dense<0xFF800000> : vector<2x256xf32>
    %2 = vector.multi_reduction <maximumf>, %0, %cst_2 [1] : vector<2x4x256xf32> to vector<2x256xf32>
    %c0_3 = arith.constant 0 : index
    %3 = memref.load %arg2[%c0_3] : memref<18xf32, #tpu.memory_space<smem>>
    %cst_4 = arith.constant 2.500000e-01 : f32
    %4 = arith.mulf %3, %cst_4 : f32
    %c1 = arith.constant 1 : index
    %5 = memref.load %arg2[%c1] : memref<18xf32, #tpu.memory_space<smem>>
    %cst_5 = arith.constant 2.500000e-01 : f32
    %6 = arith.mulf %5, %cst_5 : f32
    %c2 = arith.constant 2 : index
    %7 = memref.load %arg2[%c2] : memref<18xf32, #tpu.memory_space<smem>>
    %cst_6 = arith.constant 2.500000e-01 : f32
    %8 = arith.mulf %7, %cst_6 : f32
    %c3 = arith.constant 3 : index
    %9 = memref.load %arg2[%c3] : memref<18xf32, #tpu.memory_space<smem>>
    %cst_7 = arith.constant 2.500000e-01 : f32
    %10 = arith.mulf %9, %cst_7 : f32
    %c4 = arith.constant 4 : index
    %11 = memref.load %arg2[%c4] : memref<18xf32, #tpu.memory_space<smem>>
    %cst_8 = arith.constant 2.500000e-01 : f32
    %12 = arith.mulf %11, %cst_8 : f32
    %c5 = arith.constant 5 : index
    %13 = memref.load %arg2[%c5] : memref<18xf32, #tpu.memory_space<smem>>
    %cst_9 = arith.constant 2.500000e-01 : f32
    %14 = arith.mulf %13, %cst_9 : f32
    %c6 = arith.constant 6 : index
    %15 = memref.load %arg2[%c6] : memref<18xf32, #tpu.memory_space<smem>>
    %cst_10 = arith.constant 2.500000e-01 : f32
    %16 = arith.mulf %15, %cst_10 : f32
    %c7 = arith.constant 7 : index
    %17 = memref.load %arg2[%c7] : memref<18xf32, #tpu.memory_space<smem>>
    %cst_11 = arith.constant 2.500000e-01 : f32
    %18 = arith.mulf %17, %cst_11 : f32
    %c8 = arith.constant 8 : index
    %19 = memref.load %arg2[%c8] : memref<18xf32, #tpu.memory_space<smem>>
    %cst_12 = arith.constant 2.500000e-01 : f32
    %20 = arith.mulf %19, %cst_12 : f32
    %c9 = arith.constant 9 : index
    %21 = memref.load %arg2[%c9] : memref<18xf32, #tpu.memory_space<smem>>
    %c10 = arith.constant 10 : index
    %22 = memref.load %arg2[%c10] : memref<18xf32, #tpu.memory_space<smem>>
    %c11 = arith.constant 11 : index
    %23 = memref.load %arg2[%c11] : memref<18xf32, #tpu.memory_space<smem>>
    %c12 = arith.constant 12 : index
    %24 = memref.load %arg2[%c12] : memref<18xf32, #tpu.memory_space<smem>>
    %c13 = arith.constant 13 : index
    %25 = memref.load %arg2[%c13] : memref<18xf32, #tpu.memory_space<smem>>
    %c14 = arith.constant 14 : index
    %26 = memref.load %arg2[%c14] : memref<18xf32, #tpu.memory_space<smem>>
    %c15 = arith.constant 15 : index
    %27 = memref.load %arg2[%c15] : memref<18xf32, #tpu.memory_space<smem>>
    %c16 = arith.constant 16 : index
    %28 = memref.load %arg2[%c16] : memref<18xf32, #tpu.memory_space<smem>>
    %c17 = arith.constant 17 : index
    %29 = memref.load %arg2[%c17] : memref<18xf32, #tpu.memory_space<smem>>
    %c0_13 = arith.constant 0 : index
    %c0_14 = arith.constant 0 : index
    %30 = vector.load %arg3[%c0_13, %c0_14] : memref<1x256xi32, #tpu.memory_space<vmem>>, vector<1x256xi32>
    %cst_15 = arith.constant 0.000000e+00 : f32
    %31 = vector.broadcast %cst_15 : f32 to vector<2x256xf32>
    %cst_16 = arith.constant 0.000000e+00 : f32
    %32 = vector.broadcast %cst_16 : f32 to vector<2x256xf32>
    %cst_17 = arith.constant 0.000000e+00 : f32
    %33 = vector.broadcast %cst_17 : f32 to vector<2x17xf32>
    %34 = vector.extract_strided_slice %1 {offsets = [0, 0], sizes = [2, 239], strides = [1, 1]} : vector<2x256xf32> to vector<2x239xf32>
    %35 = tpu.concatenate %33, %34 in 1 : vector<2x17xf32>, vector<2x239xf32> -> vector<2x256xf32>
    %36 = vector.broadcast %4 : f32 to vector<2x256xf32>
    %37 = arith.mulf %36, %35 : vector<2x256xf32>
    %38 = arith.addf %32, %37 : vector<2x256xf32>
    %cst_18 = arith.constant 0.000000e+00 : f32
    %39 = vector.broadcast %cst_18 : f32 to vector<2x17xf32>
    %40 = vector.extract_strided_slice %2 {offsets = [0, 0], sizes = [2, 239], strides = [1, 1]} : vector<2x256xf32> to vector<2x239xf32>
    %41 = tpu.concatenate %39, %40 in 1 : vector<2x17xf32>, vector<2x239xf32> -> vector<2x256xf32>
    %42 = vector.broadcast %21 : f32 to vector<2x256xf32>
    %43 = arith.mulf %42, %41 : vector<2x256xf32>
    %44 = arith.addf %38, %43 : vector<2x256xf32>
    %cst_19 = arith.constant 0.000000e+00 : f32
    %45 = vector.broadcast %cst_19 : f32 to vector<2x1xf32>
    %46 = vector.extract_strided_slice %1 {offsets = [0, 0], sizes = [2, 255], strides = [1, 1]} : vector<2x256xf32> to vector<2x255xf32>
    %47 = tpu.concatenate %45, %46 in 1 : vector<2x1xf32>, vector<2x255xf32> -> vector<2x256xf32>
    %48 = vector.broadcast %10 : f32 to vector<2x256xf32>
    %49 = arith.mulf %48, %47 : vector<2x256xf32>
    %50 = arith.addf %44, %49 : vector<2x256xf32>
    %cst_20 = arith.constant 0.000000e+00 : f32
    %51 = vector.broadcast %cst_20 : f32 to vector<2x1xf32>
    %52 = vector.extract_strided_slice %2 {offsets = [0, 0], sizes = [2, 255], strides = [1, 1]} : vector<2x256xf32> to vector<2x255xf32>
    %53 = tpu.concatenate %51, %52 in 1 : vector<2x1xf32>, vector<2x255xf32> -> vector<2x256xf32>
    %54 = vector.broadcast %24 : f32 to vector<2x256xf32>
    %55 = arith.mulf %54, %53 : vector<2x256xf32>
    %56 = arith.addf %50, %55 : vector<2x256xf32>
    %57 = vector.extract_strided_slice %1 {offsets = [0, 15], sizes = [2, 241], strides = [1, 1]} : vector<2x256xf32> to vector<2x241xf32>
    %cst_21 = arith.constant 0.000000e+00 : f32
    %58 = vector.broadcast %cst_21 : f32 to vector<2x15xf32>
    %59 = tpu.concatenate %57, %58 in 1 : vector<2x241xf32>, vector<2x15xf32> -> vector<2x256xf32>
    %60 = vector.broadcast %16 : f32 to vector<2x256xf32>
    %61 = arith.mulf %60, %59 : vector<2x256xf32>
    %62 = arith.addf %56, %61 : vector<2x256xf32>
    %63 = vector.extract_strided_slice %2 {offsets = [0, 15], sizes = [2, 241], strides = [1, 1]} : vector<2x256xf32> to vector<2x241xf32>
    %cst_22 = arith.constant 0.000000e+00 : f32
    %64 = vector.broadcast %cst_22 : f32 to vector<2x15xf32>
    %65 = tpu.concatenate %63, %64 in 1 : vector<2x241xf32>, vector<2x15xf32> -> vector<2x256xf32>
    %66 = vector.broadcast %27 : f32 to vector<2x256xf32>
    %67 = arith.mulf %66, %65 : vector<2x256xf32>
    %68 = arith.addf %62, %67 : vector<2x256xf32>
    %c-1_i32 = arith.constant -1 : i32
    %69 = vector.broadcast %c-1_i32 : i32 to vector<1x256xi32>
    %70 = arith.addi %30, %69 : vector<1x256xi32>
    %c0_i32 = arith.constant 0 : i32
    %71 = vector.broadcast %c0_i32 : i32 to vector<1x256xi32>
    %72 = arith.cmpi sge, %70, %71 : vector<1x256xi32>
    %c-1_i32_23 = arith.constant -1 : i32
    %73 = vector.broadcast %c-1_i32_23 : i32 to vector<1x256xi32>
    %74 = arith.addi %30, %73 : vector<1x256xi32>
    %c15_i32 = arith.constant 15 : i32
    %75 = vector.broadcast %c15_i32 : i32 to vector<1x256xi32>
    %76 = arith.cmpi sle, %74, %75 : vector<1x256xi32>
    %77 = arith.andi %72, %76 : vector<1x256xi1>
    %cst_24 = arith.constant 0.000000e+00 : f32
    %78 = vector.shape_cast %77 : vector<1x256xi1> to vector<1x256xi1>
    %79 = vector.broadcast %78 : vector<1x256xi1> to vector<2x256xi1>
    %80 = vector.broadcast %cst_24 : f32 to vector<2x256xf32>
    %81 = arith.select %79, %68, %80 : vector<2x256xi1>, vector<2x256xf32>
    %82 = arith.addf %31, %81 : vector<2x256xf32>
    %cst_25 = arith.constant 0.000000e+00 : f32
    %83 = vector.broadcast %cst_25 : f32 to vector<2x256xf32>
    %cst_26 = arith.constant 0.000000e+00 : f32
    %84 = vector.broadcast %cst_26 : f32 to vector<2x16xf32>
    %85 = vector.extract_strided_slice %1 {offsets = [0, 0], sizes = [2, 240], strides = [1, 1]} : vector<2x256xf32> to vector<2x240xf32>
    %86 = tpu.concatenate %84, %85 in 1 : vector<2x16xf32>, vector<2x240xf32> -> vector<2x256xf32>
    %87 = vector.broadcast %6 : f32 to vector<2x256xf32>
    %88 = arith.mulf %87, %86 : vector<2x256xf32>
    %89 = arith.addf %83, %88 : vector<2x256xf32>
    %cst_27 = arith.constant 0.000000e+00 : f32
    %90 = vector.broadcast %cst_27 : f32 to vector<2x16xf32>
    %91 = vector.extract_strided_slice %2 {offsets = [0, 0], sizes = [2, 240], strides = [1, 1]} : vector<2x256xf32> to vector<2x240xf32>
    %92 = tpu.concatenate %90, %91 in 1 : vector<2x16xf32>, vector<2x240xf32> -> vector<2x256xf32>
    %93 = vector.broadcast %22 : f32 to vector<2x256xf32>
    %94 = arith.mulf %93, %92 : vector<2x256xf32>
    %95 = arith.addf %89, %94 : vector<2x256xf32>
    %96 = vector.broadcast %12 : f32 to vector<2x256xf32>
    %97 = arith.mulf %96, %1 : vector<2x256xf32>
    %98 = arith.addf %95, %97 : vector<2x256xf32>
    %99 = vector.broadcast %25 : f32 to vector<2x256xf32>
    %100 = arith.mulf %99, %2 : vector<2x256xf32>
    %101 = arith.addf %98, %100 : vector<2x256xf32>
    %102 = vector.extract_strided_slice %1 {offsets = [0, 16], sizes = [2, 240], strides = [1, 1]} : vector<2x256xf32> to vector<2x240xf32>
    %cst_28 = arith.constant 0.000000e+00 : f32
    %103 = vector.broadcast %cst_28 : f32 to vector<2x16xf32>
    %104 = tpu.concatenate %102, %103 in 1 : vector<2x240xf32>, vector<2x16xf32> -> vector<2x256xf32>
    %105 = vector.broadcast %18 : f32 to vector<2x256xf32>
    %106 = arith.mulf %105, %104 : vector<2x256xf32>
    %107 = arith.addf %101, %106 : vector<2x256xf32>
    %108 = vector.extract_strided_slice %2 {offsets = [0, 16], sizes = [2, 240], strides = [1, 1]} : vector<2x256xf32> to vector<2x240xf32>
    %cst_29 = arith.constant 0.000000e+00 : f32
    %109 = vector.broadcast %cst_29 : f32 to vector<2x16xf32>
    %110 = tpu.concatenate %108, %109 in 1 : vector<2x240xf32>, vector<2x16xf32> -> vector<2x256xf32>
    %111 = vector.broadcast %28 : f32 to vector<2x256xf32>
    %112 = arith.mulf %111, %110 : vector<2x256xf32>
    %113 = arith.addf %107, %112 : vector<2x256xf32>
    %114 = arith.addf %82, %113 : vector<2x256xf32>
    %cst_30 = arith.constant 0.000000e+00 : f32
    %115 = vector.broadcast %cst_30 : f32 to vector<2x256xf32>
    %cst_31 = arith.constant 0.000000e+00 : f32
    %116 = vector.broadcast %cst_31 : f32 to vector<2x15xf32>
    %117 = vector.extract_strided_slice %1 {offsets = [0, 0], sizes = [2, 241], strides = [1, 1]} : vector<2x256xf32> to vector<2x241xf32>
    %118 = tpu.concatenate %116, %117 in 1 : vector<2x15xf32>, vector<2x241xf32> -> vector<2x256xf32>
    %119 = vector.broadcast %8 : f32 to vector<2x256xf32>
    %120 = arith.mulf %119, %118 : vector<2x256xf32>
    %121 = arith.addf %115, %120 : vector<2x256xf32>
    %cst_32 = arith.constant 0.000000e+00 : f32
    %122 = vector.broadcast %cst_32 : f32 to vector<2x15xf32>
    %123 = vector.extract_strided_slice %2 {offsets = [0, 0], sizes = [2, 241], strides = [1, 1]} : vector<2x256xf32> to vector<2x241xf32>
    %124 = tpu.concatenate %122, %123 in 1 : vector<2x15xf32>, vector<2x241xf32> -> vector<2x256xf32>
    %125 = vector.broadcast %23 : f32 to vector<2x256xf32>
    %126 = arith.mulf %125, %124 : vector<2x256xf32>
    %127 = arith.addf %121, %126 : vector<2x256xf32>
    %128 = vector.extract_strided_slice %1 {offsets = [0, 1], sizes = [2, 255], strides = [1, 1]} : vector<2x256xf32> to vector<2x255xf32>
    %cst_33 = arith.constant 0.000000e+00 : f32
    %129 = vector.broadcast %cst_33 : f32 to vector<2x1xf32>
    %130 = tpu.concatenate %128, %129 in 1 : vector<2x255xf32>, vector<2x1xf32> -> vector<2x256xf32>
    %131 = vector.broadcast %14 : f32 to vector<2x256xf32>
    %132 = arith.mulf %131, %130 : vector<2x256xf32>
    %133 = arith.addf %127, %132 : vector<2x256xf32>
    %134 = vector.extract_strided_slice %2 {offsets = [0, 1], sizes = [2, 255], strides = [1, 1]} : vector<2x256xf32> to vector<2x255xf32>
    %cst_34 = arith.constant 0.000000e+00 : f32
    %135 = vector.broadcast %cst_34 : f32 to vector<2x1xf32>
    %136 = tpu.concatenate %134, %135 in 1 : vector<2x255xf32>, vector<2x1xf32> -> vector<2x256xf32>
    %137 = vector.broadcast %26 : f32 to vector<2x256xf32>
    %138 = arith.mulf %137, %136 : vector<2x256xf32>
    %139 = arith.addf %133, %138 : vector<2x256xf32>
    %140 = vector.extract_strided_slice %1 {offsets = [0, 17], sizes = [2, 239], strides = [1, 1]} : vector<2x256xf32> to vector<2x239xf32>
    %cst_35 = arith.constant 0.000000e+00 : f32
    %141 = vector.broadcast %cst_35 : f32 to vector<2x17xf32>
    %142 = tpu.concatenate %140, %141 in 1 : vector<2x239xf32>, vector<2x17xf32> -> vector<2x256xf32>
    %143 = vector.broadcast %20 : f32 to vector<2x256xf32>
    %144 = arith.mulf %143, %142 : vector<2x256xf32>
    %145 = arith.addf %139, %144 : vector<2x256xf32>
    %146 = vector.extract_strided_slice %2 {offsets = [0, 17], sizes = [2, 239], strides = [1, 1]} : vector<2x256xf32> to vector<2x239xf32>
    %cst_36 = arith.constant 0.000000e+00 : f32
    %147 = vector.broadcast %cst_36 : f32 to vector<2x17xf32>
    %148 = tpu.concatenate %146, %147 in 1 : vector<2x239xf32>, vector<2x17xf32> -> vector<2x256xf32>
    %149 = vector.broadcast %29 : f32 to vector<2x256xf32>
    %150 = arith.mulf %149, %148 : vector<2x256xf32>
    %151 = arith.addf %145, %150 : vector<2x256xf32>
    %c1_i32 = arith.constant 1 : i32
    %152 = vector.broadcast %c1_i32 : i32 to vector<1x256xi32>
    %153 = arith.addi %30, %152 : vector<1x256xi32>
    %c0_i32_37 = arith.constant 0 : i32
    %154 = vector.broadcast %c0_i32_37 : i32 to vector<1x256xi32>
    %155 = arith.cmpi sge, %153, %154 : vector<1x256xi32>
    %c1_i32_38 = arith.constant 1 : i32
    %156 = vector.broadcast %c1_i32_38 : i32 to vector<1x256xi32>
    %157 = arith.addi %30, %156 : vector<1x256xi32>
    %c15_i32_39 = arith.constant 15 : i32
    %158 = vector.broadcast %c15_i32_39 : i32 to vector<1x256xi32>
    %159 = arith.cmpi sle, %157, %158 : vector<1x256xi32>
    %160 = arith.andi %155, %159 : vector<1x256xi1>
    %cst_40 = arith.constant 0.000000e+00 : f32
    %161 = vector.shape_cast %160 : vector<1x256xi1> to vector<1x256xi1>
    %162 = vector.broadcast %161 : vector<1x256xi1> to vector<2x256xi1>
    %163 = vector.broadcast %cst_40 : f32 to vector<2x256xf32>
    %164 = arith.select %162, %151, %163 : vector<2x256xi1>, vector<2x256xf32>
    %165 = arith.addf %114, %164 : vector<2x256xf32>
    %cst_41 = arith.constant 0.000000e+00 : f32
    %166 = vector.broadcast %cst_41 : f32 to vector<2x256xf32>
    %167 = arith.maximumf %165, %166 : vector<2x256xf32>
    %c0_42 = arith.constant 0 : index
    %c0_43 = arith.constant 0 : index
    %c0_44 = arith.constant 0 : index
    %168 = vector.load %arg4[%c0_42, %c0_43, %c0_44] : memref<2x1x256xf32, #tpu.memory_space<vmem>>, vector<2x1x256xf32>
    %169 = vector.shape_cast %168 : vector<2x1x256xf32> to vector<2x256xf32>
    %170 = vector.shape_cast %167 : vector<2x256xf32> to vector<2x1x256xf32>
    tpu.vector_store %arg4[%c0_42, %c0_43, %c0_44], %170 {strides = array<i32>} : memref<2x1x256xf32, #tpu.memory_space<vmem>>, vector<2x1x256xf32>,
    return
  }
  func.func @transform_0(%arg0: i32) -> (i32, i32, i32) {
    %c0_i32 = arith.constant 0 : i32
    %c0_i32_0 = arith.constant 0 : i32
    %c0_i32_1 = arith.constant 0 : i32
    return %arg0, %c0_i32, %c0_i32_0 : i32, i32, i32
  }
  func.func @transform_1(%arg0: i32) -> i32 {
    %c0_i32 = arith.constant 0 : i32
    %c0_i32_0 = arith.constant 0 : i32
    return %c0_i32 : i32
  }
  func.func @transform_2(%arg0: i32) -> (i32, i32) {
    %c0_i32 = arith.constant 0 : i32
    %c0_i32_0 = arith.constant 0 : i32
    %c0_i32_1 = arith.constant 0 : i32
    return %c0_i32, %c0_i32_0 : i32, i32
  }
  func.func @transform_3(%arg0: i32) -> (i32, i32, i32) {
    %c0_i32 = arith.constant 0 : i32
    %c0_i32_0 = arith.constant 0 : i32
    %c0_i32_1 = arith.constant 0 : i32
    return %arg0, %c0_i32, %c0_i32_0 : i32, i32, i32
  }
}

</mosaic_0001>

<bundles_post_ra>
// kernel: spacial_attention_2d.1
= control target key start
LH: loop header
LB: loop body
LE: loop exit
PB: predicated region body
PF: predicated region fallthrough
CT: control target
= control target key end

     0   :  { %8 = vsyncpa [#allocation3], 0  ;;  %s781_s0 = inlined_call_operand.vmem [shape: f32[2,4,256], index: 0, kind: input, shape index: {}]   ;;  %s782_s1 = inlined_call_operand.vmem [shape: f32[18], index: 1, kind: input, shape index: {}]   ;;  %s783_s2 = inlined_call_operand.vmem [shape: s32[1,256], index: 2, kind: input, shape index: {}]   ;;  %s784_s3 = inlined_call_operand.vmem [shape: f32[2,1,256], index: 3, kind: output, shape index: {}]  }
   0x1   :  { %s17_s14 = sshll.u32 %s782_s1, 4  ;;  %s18_s14 = int_to_ptr.vmem [resolvable:$true] %s17_s14 }
   0x2   :  { %s489_s15 = scalar_lea.vmem %s18_s14, 16  ;;  %p494_p1 = scmp.lt.s32.totalorder %s18_s14, %s18_s14 }
   0x3   :  { %p490_p0 = scmp.ne.s32.totalorder %s18_s14, %s489_s15  ;;  %p495_p2 = scmp.lt.s32.totalorder %s489_s15, %s489_s15 }
   0x5   :  { %p496_p3 = por %p495_p2, %p494_p1 }
   0x7   :  { %p497_p4 = pnand %p496_p3, %p490_p0 }
   0x9   :  { %500 = shalt.err (!%p497_p4)
}
   0xa   :  { %s503_s16 = smov [#allocation2]  }
   0xb   :  { %20 = dma.vmem_to_smem %s18_s14, 16, %s503_s16, [#allocation3]  }
   0xc   :  { %501 = dma.done.wait [#allocation3], 16  }
   0xd   :  { %502 = vsyncadd [#allocation3], 4294967280 }
   0xe   :  { %26 = sfence }
   0xf   :  { %v27_v0 = vld [vmem:[%s781_s0] sm:$0xff]  ;;  %v28_v1 = vld [vmem:[%s781_s0 + $0x8] sm:$0xff]  ;;  %vm35_vm0 = vcmask 1043456   ;;  %vm124_vm1 = vcmask 1041409   ;;  %s551_s0 = sld [smem:[#allocation2 + $0x4]]  ;;  %s504_s22 = smov 17  }
  0x10   :  { %v64_v2 = vsel %vm35_vm0, %v27_v0, -inf  ;;  %v78_v3 = vsel %vm35_vm0, %v28_v1, -inf  ;;  %v36_v4 = vsel %vm35_vm0, %v27_v0, 0.0  ;;  %v50_v5 = vsel %vm35_vm0, %v28_v1, 0.0  ;;  %s471_s1 = sld [smem:[#allocation2 + $0xd]]  ;;  %s505_s23 = smov 16  }
  0x11   :  { %v65_v6 = vrot.slane %v64_v2, 4  ;;  %v79_v7 = vrot.slane %v78_v3, 4  ;;  %v37_v8 = vrot.slane %v36_v4, 4  ;;  %v51_v9 = vrot.slane %v50_v5, 4  ;;  %s506_s24 = smov 1   ;;  %s507_s25 = smov 15  }
  0x12   :  { %v31_v10 = vcombine.high %v27_v0, %v27_v0  ;;  %v32_v11 = vcombine.high %v28_v1, %v28_v1  ;;  %s508_s26 = smov 127   ;;  %s509_s27 = smov 113   ;;  %vm237_vm2 = vcmask 130048   ;;  %vm131_vm5 = vcmask 138240  }
  0x13   :  { %v66_v12 = vmax.f32 %v64_v2, %v65_v6  ;;  %v80_v13 = vmax.f32 %v78_v3, %v79_v7  ;;  %v38_v14 = vadd.f32 %v37_v8, %v36_v4  ;;  %v52_v15 = vadd.f32 %v51_v9, %v50_v5  ;;  %s510_s28 = smov 112   ;;  %s511_s29 = smov 111  }
  0x14   :  { %v71_v16 = vsel %vm35_vm0, %v31_v10, -inf  ;;  %v85_v17 = vsel %vm35_vm0, %v32_v11, -inf  ;;  %v43_v18 = vsel %vm35_vm0, %v31_v10, 0.0  ;;  %v57_v19 = vsel %vm35_vm0, %v32_v11, 0.0  ;;  %s459_s30 = sld [smem:[#allocation2 + $0x1]] }
  0x15   :  { %v67_v20 = vrot.slane %v66_v12, 2  ;;  %v81_v21 = vrot.slane %v80_v13, 2  ;;  %v39_v22 = vrot.slane %v38_v14, 2  ;;  %v53_v23 = vrot.slane %v52_v15, 2  ;;  %s101_s21 = smul.f32 0.25, %s551_s0  ;;  %s468_s4 = sld [smem:[#allocation2 + $0xa]] }
  0x16   :  { %v72_v24 = vrot.slane %v71_v16, 4  ;;  %v86_v25 = vrot.slane %v85_v17, 4  ;;  %v44_v26 = vrot.slane %v43_v18, 4  ;;  %v58_v27 = vrot.slane %v57_v19, 4  ;;  %s607_s6 = sld [smem:[#allocation2 + $0x9]] }
  0x17   :  { %v68_v28 = vmax.f32 %v66_v12, %v67_v20  ;;  %v82_v29 = vmax.f32 %v80_v13, %v81_v21  ;;  %v40_v30 = vadd.f32 %v39_v22, %v38_v14  ;;  %v54_v31 = vadd.f32 %v53_v23, %v52_v15  ;;  %s609_s7 = sld [smem:[#allocation2]] }
  0x18   :  { %v73_v32 = vmax.f32 %v71_v16, %v72_v24  ;;  %v87_v33 = vmax.f32 %v85_v17, %v86_v25  ;;  %v45_v34 = vadd.f32 %v44_v26, %v43_v18  ;;  %v59_v35 = vadd.f32 %v58_v27, %v57_v19  ;;  %s611_s8 = sld [smem:[#allocation2 + $0x3]] }
  0x19   :  { %v69_v36 = vrot.slane %v68_v28, 1  ;;  %v83_v37 = vrot.slane %v82_v29, 1  ;;  %v41_v38 = vrot.slane %v40_v30, 1  ;;  %v55_v39 = vrot.slane %v54_v31, 1  ;;  %s615_s9 = sld [smem:[#allocation2 + $0x2]] }
  0x1a   :  { %v74_v40 = vrot.slane %v73_v32, 2  ;;  %v88_v41 = vrot.slane %v87_v33, 2  ;;  %v46_v42 = vrot.slane %v45_v34, 2  ;;  %v60_v43 = vrot.slane %v59_v35, 2  ;;  %s95_s5 = smul.f32 0.25, %s459_s30  ;;  %s619_s10 = sld [smem:[#allocation2 + $0xb]] }
  0x1b   :  { %v70_v44 = vmax.f32 %v68_v28, %v69_v36  ;;  %v84_v45 = vmax.f32 %v82_v29, %v83_v37  ;;  %v42_v46 = vadd.f32 %v41_v38, %v40_v30  ;;  %v56_v47 = vadd.f32 %v55_v39, %v54_v31  ;;  %s621_s11 = sld [smem:[#allocation2 + $0xc]] }
  0x1c   :  { %v75_v48 = vmax.f32 %v73_v32, %v74_v40  ;;  %v89_v49 = vmax.f32 %v87_v33, %v88_v41  ;;  %v47_v50 = vadd.f32 %v46_v42, %v45_v34  ;;  %v61_v51 = vadd.f32 %v60_v43, %v59_v35  ;;  %s628_s14 = sld [smem:[#allocation2 + $0x5]] }
  0x1d   :  { %v555_v52 = vsel %vm124_vm1, %v84_v45, %v70_v44  ;;  %v125_v53 = vsel %vm124_vm1, %v56_v47, %v42_v46  ;;  %v260_v58 = vstv %s101_s21  ;;  %v275_v6 = vstv %s471_s1  ;;  %s632_s15 = sld [smem:[#allocation2 + $0x6]]  ;;  %s93_s17 = smul.f32 0.25, %s609_s7 }
  0x1e   :  { %147 = vrot.lane.b32.xlu1 %v555_v52, %s504_s22  ;;  %127 = vrot.lane.b32.xlu0 %v125_v53, %s504_s22  ;;  %v76_v54 = vrot.slane %v75_v48, 1  ;;  %v90_v55 = vrot.slane %v89_v49, 1  ;;  %v48_v56 = vrot.slane %v47_v50, 1  ;;  %v62_v57 = vrot.slane %v61_v51, 1  ;;  %s634_s16 = sld [smem:[#allocation2 + $0x7]] }
  0x1f   :  { %v261_v63 = vmul.f32 %v260_v58, %v42_v46  ;;  %v263_v0 = vmul.f32 %v260_v58, %v56_v47  ;;  %v276_v10 = vmul.f32 %v275_v6, %v70_v44  ;;  %v278_v11 = vmul.f32 %v275_v6, %v84_v45  ;;  %v119_v44 = vld [vmem:[%s783_s2] sm:$0x3]  ;;  %s639_s18 = sld [smem:[#allocation2 + $0x8]]  ;;  %s99_s2 = smul.f32 0.25, %s611_s8 }
  0x20   :  { %v77_v59 = vmax.f32 %v75_v48, %v76_v54  ;;  %v91_v60 = vmax.f32 %v89_v49, %v90_v55  ;;  %v49_v61 = vadd.f32 %v48_v56, %v47_v50  ;;  %v63_v62 = vadd.f32 %v62_v57, %v61_v51  ;;  %s644_s19 = sld [smem:[#allocation2 + $0xe]]  ;;  %s97_s20 = smul.f32 0.25, %s615_s9 }
  0x21   :  { %v565_v5 = vsel %vm124_vm1, %v263_v0, %v261_v63  ;;  %v284_v13 = vsel %vm124_vm1, %v278_v11, %v276_v10  ;;  %v242_v18 = vstv %s95_s5  ;;  %v255_v20 = vstv %s468_s4  ;;  %s647_s0 = sld [smem:[#allocation2 + $0xf]] }
  0x22   :  { %233 = vrot.lane.b32.xlu0 %v125_v53, %s505_s23  ;;  %v146_v1 = vsel %vm124_vm1, %v91_v60, %v77_v59  ;;  %v262_v2 = vmul.f32 %v260_v58, %v49_v61  ;;  %v264_v3 = vmul.f32 %v260_v58, %v63_v62  ;;  %v126_v4 = vsel %vm124_vm1, %v63_v62, %v49_v61  ;;  %s103_s1 = smul.f32 0.25, %s628_s14  ;;  %s656_s21 = sld [smem:[#allocation2 + $0x10]] }
  0x23   :  { %149 = vrot.lane.b32.xlu1 %v146_v1, %s504_s22  ;;  %v277_v8 = vmul.f32 %v275_v6, %v77_v59  ;;  %v279_v9 = vmul.f32 %v275_v6, %v91_v60  ;;  %v214_v47 = vadd.s32 4294967295, %v119_v44  ;;  %v219_v48 = vlaneseq }
  0x24   :  { %v568_v7 = vsel %vm124_vm1, %v264_v3, %v262_v2  ;;  %v400_v54 = vadd.s32 1, %v119_v44  ;;  %v136_v55 = vstv %s93_s17  ;;  %vm164_vm6 = vcmask 7168  }
  0x25   :  { %v572_v12 = vsel %vm124_vm1, %v279_v9, %v277_v8  ;;  %vm215_vm3 = vcmp.ge.s32.totalorder %v214_v47, 0  ;;  %vm216_vm4 = vcmp.le.s32.totalorder %v214_v47, 15  ;;  %v650_v51 = vshrl.u32 %v219_v48, 7 }
  0x26   :  { %247 = vrot.lane.b32.xlu0 %v555_v52, %s505_s23  ;;  %v169_v56 = vstv %s99_s2  ;;  %vm217_vm7 = vmand %vm215_vm3, %vm216_vm4  ;;  %vm323_vm8 = vcmask 121856   ;;  %v328_v58 = vstv %s97_s20  ;;  %v341_v59 = vstv %s619_s10 }
  0x27   :  { %235 = vrot.lane.b32.xlu1 %v126_v4, %s505_s23  ;;  %v182_v60 = vstv %s621_s11  ;;  %vm350_vm9 = vcmask 1039360   ;;  %v225_v62 = vsub.s32 1, %v650_v51  ;;  %v221_v63 = vsub.s32 0, %v650_v51 }
  0x28   :  { %v355_v0 = vstv %s103_s1  ;;  %v512_v2 = vmov 0   ;;  %vm401_vm10 = vcmp.ge.s32.totalorder %v400_v54, 0  ;;  %vm402_vm11 = vcmp.le.s32.totalorder %v400_v54, 15 }
  0x29   :  { %v218_v3 = vsel %vm217_vm7, 1, %v512_v2  ;;  %vm191_vm12 = vcmask 924672   ;;  %v368_v6 = vstv %s644_s19  ;;  %vm294_vm13 = vcmask 916480   ;;  %vm403_vm14 = vmand %vm401_vm10, %vm402_vm11 }
  0x2a   :  { %160 = vrot.lane.b32.xlu0 %v125_v53, %s506_s24  ;;  %vm377_vm15 = vcmask 908288   ;;  %vm450_vm4 = vcmp.lt.s32.totalorder %v219_v48, 256 }
  0x2b   :  { %249 = vrot.lane.b32.xlu1 %v146_v1, %s505_s23  ;;  %s662_s23 = sld [smem:[#allocation2 + $0x11]] }
  0x2e   :  { %129 = vrot.lane.b32.xlu0 %v126_v4, %s504_s22  ;;  %s105_s22 = smul.f32 0.25, %s632_s15 }
  0x2f   :  { %162 = vrot.lane.b32.xlu1 %v126_v4, %s506_s24 }
  0x32   :  { %319 = vrot.lane.b32.xlu0 %v125_v53, %s507_s25 }
  0x33   :  { %321 = vrot.lane.b32.xlu1 %v126_v4, %s507_s25 }
  0x36   :  { %333 = vrot.lane.b32.xlu0 %v555_v52, %s507_s25 }
  0x37   :  { %335 = vrot.lane.b32.xlu1 %v146_v1, %s507_s25  ;;  %s109_s25 = smul.f32 0.25, %s639_s18 }
  0x3a   :  { %174 = vrot.lane.b32.xlu0 %v555_v52, %s506_s24 }
  0x3b   :  { %176 = vrot.lane.b32.xlu1 %v146_v1, %s506_s24  ;;  %s107_s24 = smul.f32 0.25, %s634_s16 }
  0x3d   :  { %v682_v11 = vstv %s107_s24 }
  0x3e   :  { %346 = vrot.lane.b32.xlu0 %v125_v53, %s508_s26 }
  0x3f   :  { %348 = vrot.lane.b32.xlu1 %v126_v4, %s508_s26 }
  0x42   :  { %187 = vrot.lane.b32.xlu0 %v125_v53, %s509_s27 }
  0x43   :  { %189 = vrot.lane.b32.xlu1 %v126_v4, %s509_s27 }
  0x46   :  { %360 = vrot.lane.b32.xlu0 %v555_v52, %s508_s26 }
  0x47   :  { %362 = vrot.lane.b32.xlu1 %v146_v1, %s508_s26 }
  0x4a   :  { %290 = vrot.lane.b32.xlu0 %v125_v53, %s510_s28 }
  0x4b   :  { %292 = vrot.lane.b32.xlu1 %v126_v4, %s510_s28 }
  0x4e   :  { %201 = vrot.lane.b32.xlu0 %v555_v52, %s509_s27 }
  0x4f   :  { %203 = vrot.lane.b32.xlu1 %v146_v1, %s509_s27 }
  0x52   :  { %373 = vrot.lane.b32.xlu0 %v125_v53, %s511_s29 }
  0x53   :  { %375 = vrot.lane.b32.xlu1 %v126_v4, %s511_s29 }
  0x56   :  { %304 = vrot.lane.b32.xlu0 %v555_v52, %s510_s28 }
  0x57   :  { %306 = vrot.lane.b32.xlu1 %v146_v1, %s510_s28 }
  0x5a   :  { %387 = vrot.lane.b32.xlu0 %v555_v52, %s511_s29  ;;  %v155_v52 = vstv %s607_s6 }
  0x5b   :  { %389 = vrot.lane.b32.xlu1 %v146_v1, %s511_s29 }
  0x90   :  { %v582_v14 = vpop.permute.xlu1 %147  ;;  %v584_v15 = vpop.permute.xlu0 %127 }
  0x91   :  { %v154_v8 = vsel %vm131_vm5, 0.0, %v582_v14  ;;  %v135_v9 = vsel %vm131_vm5, 0.0, %v584_v15 }
  0x94   :  { %v234_v16 = vpop.permute.xlu0 %233 }
  0x95   :  { %v586_v17 = vpop.permute.xlu1 %149  ;;  %v241_v19 = vsel %vm237_vm2, 0.0, %v234_v16 }
  0x96   :  { %v243_v24 = vmul.f32 %v242_v18, %v241_v19  ;;  %v151_v4 = vsel %vm131_vm5, %v582_v14, %v586_v17  ;;  %v691_v17 = vrot.slane %v218_v3, %v221_v63 }
  0x97   :  { %v157_v14 = vmul.f32 %v155_v52, %v151_v4 }
  0x98   :  { %v248_v21 = vpop.permute.xlu0 %247  ;;  %vm227_vm1 = vcmp.eq.s32.totalorder %v691_v17, 1 }
  0x99   :  { %v254_v22 = vsel %vm237_vm2, 0.0, %v248_v21  ;;  %v236_v23 = vpop.permute.xlu1 %235 }
  0x9a   :  { %v256_v25 = vmul.f32 %v255_v20, %v254_v22  ;;  %v238_v27 = vsel %vm237_vm2, %v234_v16, %v236_v23  ;;  %v687_v16 = vrot.slane %v218_v3, %v225_v62  ;;  %v137_v22 = vmul.f32 %v136_v55, %v135_v9 }
  0x9b   :  { %v244_v32 = vmul.f32 %v242_v18, %v238_v27 }
  0x9c   :  { %v258_v26 = vadd.f32 %v256_v25, %v243_v24  ;;  %v591_v28 = vpop.permute.xlu0 %160  ;;  %v312_v24 = vstv %s656_s21  ;;  %v395_v25 = vstv %s662_s23  ;;  %vm228_vm0 = vcmp.eq.s32.totalorder %v687_v16, 1 }
  0x9d   :  { %v250_v29 = vpop.permute.xlu1 %249 }
  0x9e   :  { %v273_v30 = vadd.f32 %v565_v5, %v258_v26  ;;  %v251_v31 = vsel %vm237_vm2, %v248_v21, %v250_v29  ;;  %v196_v5 = vstv %s105_s22  ;;  %v156_v21 = vmul.f32 %v155_v52, %v154_v8 }
  0x9f   :  { %v257_v33 = vmul.f32 %v255_v20, %v251_v31  ;;  %v700_v20 = vstv %s109_s25 }
  0xa0   :  { %v130_v34 = vpop.permute.xlu0 %129  ;;  %v595_v35 = vadd.f32 %v284_v13, %v273_v30  ;;  %v209_v13 = vstv %s647_s0  ;;  %v404_v30 = vsel %vm403_vm14, 1, %v512_v2 }
  0xa1   :  { %v259_v36 = vadd.f32 %v257_v33, %v244_v32  ;;  %v597_v37 = vpop.permute.xlu1 %162  ;;  %v132_v61 = vsel %vm131_vm5, %v584_v15, %v130_v34  ;;  %v722_v44 = vrot.slane %v404_v30, %v225_v62 }
  0xa2   :  { %v138_v10 = vmul.f32 %v136_v55, %v132_v61  ;;  %v165_v27 = vsel %vm164_vm6, %v591_v28, %v597_v37 }
  0xa3   :  { %v274_v38 = vadd.f32 %v568_v7, %v259_v36  ;;  %vm414_vm2 = vcmp.eq.s32.totalorder %v722_v44, 1 }
  0xa4   :  { %v600_v39 = vpop.permute.xlu0 %319  ;;  %v159_v29 = vadd.f32 %v157_v14, %v138_v10 }
  0xa5   :  { %v602_v40 = vpop.permute.xlu1 %321  ;;  %v605_v41 = vadd.f32 %v572_v12, %v274_v38  ;;  %v168_v12 = vsel %vm164_vm6, 0.0, %v591_v28  ;;  %v327_v32 = vsel %vm323_vm8, 0.0, %v600_v39 }
  0xa6   :  { %v170_v26 = vmul.f32 %v169_v56, %v168_v12  ;;  %v324_v31 = vsel %vm323_vm8, %v600_v39, %v602_v40  ;;  %v329_v47 = vmul.f32 %v328_v58, %v327_v32 }
  0xa7   :  { %v330_v52 = vmul.f32 %v328_v58, %v324_v31 }
  0xa8   :  { %v613_v42 = vpop.permute.xlu0 %333 }
  0xa9   :  { %v617_v43 = vpop.permute.xlu1 %335  ;;  %v340_v18 = vsel %vm323_vm8, 0.0, %v613_v42 }
  0xaa   :  { %v337_v15 = vsel %vm323_vm8, %v613_v42, %v617_v43  ;;  %v342_v33 = vmul.f32 %v341_v59, %v340_v18  ;;  %v158_v42 = vadd.f32 %v156_v21, %v137_v22  ;;  %v171_v43 = vmul.f32 %v169_v56, %v165_v27 }
  0xab   :  { %v343_v34 = vmul.f32 %v341_v59, %v337_v15 }
  0xac   :  { %v626_v45 = vpop.permute.xlu0 %174  ;;  %v173_v56 = vadd.f32 %v171_v43, %v159_v29 }
  0xad   :  { %v630_v46 = vpop.permute.xlu1 %176  ;;  %v181_v38 = vsel %vm164_vm6, 0.0, %v626_v45  ;;  %v345_v2 = vadd.f32 %v343_v34, %v330_v52 }
  0xae   :  { %v178_v36 = vsel %vm164_vm6, %v626_v45, %v630_v46  ;;  %v183_v54 = vmul.f32 %v182_v60, %v181_v38 }
  0xaf   :  { %v184_v55 = vmul.f32 %v182_v60, %v178_v36 }
  0xb0   :  { %v637_v49 = vpop.permute.xlu0 %346 }
  0xb1   :  { %v642_v50 = vpop.permute.xlu1 %348 }
  0xb2   :  { %v354_v28 = vsel %vm350_vm9, %v642_v50, 0.0  ;;  %v351_v37 = vsel %vm350_vm9, %v637_v49, %v642_v50  ;;  %v172_v49 = vadd.f32 %v170_v26, %v158_v42  ;;  %v344_v50 = vadd.f32 %v342_v33, %v329_v47 }
  0xb3   :  { %v357_v59 = vmul.f32 %v355_v0, %v354_v28  ;;  %v356_v61 = vmul.f32 %v355_v0, %v351_v37  ;;  %v513_v37 = vmov 1966171168  }
  0xb4   :  { %v654_v53 = vpop.permute.xlu0 %187  ;;  %v185_v0 = vadd.f32 %v183_v54, %v172_v49 }
  0xb5   :  { %v659_v57 = vpop.permute.xlu1 %189  ;;  %v359_v12 = vadd.f32 %v357_v59, %v345_v2  ;;  %v358_v14 = vadd.f32 %v356_v61, %v344_v50 }
  0xb6   :  { %v195_v46 = vsel %vm191_vm12, %v659_v57, 0.0  ;;  %v192_v45 = vsel %vm191_vm12, %v654_v53, %v659_v57 }
  0xb7   :  { %v198_v62 = vmul.f32 %v196_v5, %v195_v46  ;;  %v197_v4 = vmul.f32 %v196_v5, %v192_v45  ;;  %v186_v5 = vadd.f32 %v184_v55, %v173_v56 }
  0xb8   :  { %v671_v1 = vpop.permute.xlu0 %360 }
  0xb9   :  { %v363_v7 = vpop.permute.xlu1 %362  ;;  %v200_v29 = vadd.f32 %v198_v62, %v186_v5  ;;  %v199_v31 = vadd.f32 %v197_v4, %v185_v0 }
  0xba   :  { %v367_v10 = vsel %vm350_vm9, %v363_v7, 0.0  ;;  %v364_v53 = vsel %vm350_vm9, %v671_v1, %v363_v7 }
  0xbb   :  { %v370_v21 = vmul.f32 %v368_v6, %v367_v10  ;;  %v369_v22 = vmul.f32 %v368_v6, %v364_v53 }
  0xbc   :  { %v291_v19 = vpop.permute.xlu0 %290 }
  0xbd   :  { %v293_v23 = vpop.permute.xlu1 %292  ;;  %v372_v43 = vadd.f32 %v370_v21, %v359_v12 }
  0xbe   :  { %v298_v58 = vsel %vm294_vm13, %v293_v23, 0.0  ;;  %v295_v8 = vsel %vm294_vm13, %v291_v19, %v293_v23 }
  0xbf   :  { %v301_v15 = vmul.f32 %v682_v11, %v298_v58  ;;  %v300_v18 = vmul.f32 %v682_v11, %v295_v8 }
  0xc0   :  { %v202_v40 = vpop.permute.xlu0 %201 }
  0xc1   :  { %v204_v39 = vpop.permute.xlu1 %203  ;;  %v303_v6 = vadd.f32 %v301_v15, %v605_v41  ;;  %v302_v28 = vadd.f32 %v300_v18, %v595_v35 }
  0xc2   :  { %v208_v57 = vsel %vm191_vm12, %v204_v39, 0.0  ;;  %v205_v60 = vsel %vm191_vm12, %v202_v40, %v204_v39  ;;  %v425_v40 = vunpack.c.l.s4 %v513_v37  ;;  %v371_v39 = vadd.f32 %v369_v22, %v358_v14 }
  0xc3   :  { %v211_v23 = vmul.f32 %v209_v13, %v208_v57  ;;  %v210_v26 = vmul.f32 %v209_v13, %v205_v60  ;;  %v408_v13 = vrot.slane %v404_v30, %v221_v63 }
  0xc4   :  { %v374_v3 = vpop.permute.xlu0 %373  ;;  %v426_v56 = vunpack.c.0.s8 %v425_v40 }
  0xc5   :  { %v376_v9 = vpop.permute.xlu1 %375  ;;  %v213_v47 = vadd.f32 %v211_v23, %v200_v29  ;;  %vm413_vm3 = vcmp.eq.s32.totalorder %v408_v13, 1 }
  0xc6   :  { %v381_v1 = vsel %vm377_vm15, %v376_v9, 0.0  ;;  %v378_v7 = vsel %vm377_vm15, %v374_v3, %v376_v9 }
  0xc7   :  { %v384_v33 = vmul.f32 %v700_v20, %v381_v1  ;;  %v383_v34 = vmul.f32 %v700_v20, %v378_v7  ;;  %v212_v20 = vadd.f32 %v210_v26, %v199_v31  ;;  %v230_v30 = vsel %vm228_vm0, %v213_v47, 0.0 }
  0xc8   :  { %v305_v19 = vpop.permute.xlu0 %304 }
  0xc9   :  { %v307_v27 = vpop.permute.xlu1 %306  ;;  %v386_v35 = vadd.f32 %v384_v33, %v372_v43  ;;  %v385_v54 = vadd.f32 %v383_v34, %v371_v39  ;;  %v229_v59 = vsel %vm227_vm1, %v212_v20, 0.0 }
  0xca   :  { %v311_v32 = vsel %vm294_vm13, %v307_v27, 0.0  ;;  %v308_v11 = vsel %vm294_vm13, %v305_v19, %v307_v27 }
  0xcb   :  { %v314_v36 = vmul.f32 %v312_v24, %v311_v32  ;;  %v313_v38 = vmul.f32 %v312_v24, %v308_v11 }
  0xcc   :  { %v388_v42 = vpop.permute.xlu0 %387 }
  0xcd   :  { %v390_v52 = vpop.permute.xlu1 %389  ;;  %v316_v46 = vadd.f32 %v314_v36, %v303_v6  ;;  %v315_v45 = vadd.f32 %v313_v38, %v302_v28 }
  0xce   :  { %v394_v24 = vsel %vm377_vm15, %v390_v52, 0.0  ;;  %v391_v41 = vsel %vm377_vm15, %v388_v42, %v390_v52 }
  0xcf   :  { %v397_v55 = vmul.f32 %v395_v25, %v394_v24  ;;  %v396_v63 = vmul.f32 %v395_v25, %v391_v41  ;;  %v318_v50 = vadd.f32 %v316_v46, %v230_v30  ;;  %v317_v2 = vadd.f32 %v315_v45, %v229_v59 }
  0xd0   :  { %v429_v25 = vsub.s32 %v426_v56, %v650_v51 }
  0xd1   :  { %v399_v61 = vadd.f32 %v397_v55, %v386_v35  ;;  %v398_v49 = vadd.f32 %v396_v63, %v385_v54 }
  0xd3   :  { %v416_v3 = vsel %vm414_vm2, %v399_v61, 0.0  ;;  %v415_v62 = vsel %vm413_vm3, %v398_v49, 0.0 }
  0xd4   :  { %v418_v4 = vadd.f32 %v416_v3, %v318_v50  ;;  %v417_v58 = vadd.f32 %v415_v62, %v317_v2 }
  0xd6   :  { %v420_v8 = vmax.f32 %v418_v4, 0.0  ;;  %v419_v44 = vmax.f32 %v417_v58, 0.0 }
  0xd8   :  { %v423_v9 = vcombine.low %v419_v44, %v420_v8 }
  0xda   :  { %v430_v10 = vrot.slane %v423_v9, %v429_v25 }
  0xdc   :  { %v431_v16 = vcombine.high %v430_v10, %v430_v10  ;;  %v438_v17 = vrot.slane %v430_v10, %v429_v25 }
  0xde   :  { %v445_v53 = vrot.slane %v431_v16, %v429_v25  ;;  %452 = vst.msk [vmem:[%s784_s3] sm:$0x3] %vm450_vm4, %v438_v17 }
  0xe0   :  { %453 = vst.msk [vmem:[%s784_s3 + $0x2] sm:$0x3] %vm450_vm4, %v445_v53 }
  0xe1   :  { %458 = vsyncpa [#allocation3], 1 }

</bundles_post_ra>
